<compile_context>
chip_gen: v7x
topology: tpu7x:2x2x1
jax: 0.10.0
libtpu: 0.0.40
codegen_flags: <defaults>
</compile_context>

<pallas_src>
import math

import jax
import jax.numpy as jnp
from jax.experimental import pallas as pl
from jax.experimental.pallas import tpu as pltpu


# --------------------------------------------------------------------------
# helpers
# --------------------------------------------------------------------------
def _round_up(x, m):
    return (x + m - 1) // m * m


def _cdiv(a, b):
    return (a + b - 1) // b


def _sublane(itemsize):
    # native sublane tile: 8 for 4-byte, 16 for 2-byte, 32 for 1-byte dtypes
    return max(8, 32 // itemsize)


_TARGET_STEP_BYTES = 2 * 1024 * 1024   # ~2 MiB single-buffered (~4 MiB w/ double-buffer)
_MIN_GRID_STEPS = 8


def _choose_tiling(N, C1, C2, HW, hW, itemsize):
    """Pick (mode, batch block bn, channel tile ct) from padded-byte accounting."""
    sub = _sublane(itemsize)
    HWp = _round_up(HW, 128)
    hWp = _round_up(hW, 128)

    g = math.gcd(C1, C2)
    # Valid channel tiles: divide both C1 and C2 AND are sublane multiples, so
    # all three BlockSpecs satisfy the (8,128) rule without escape hatches.
    valid_cts = [d for d in range(sub, g + 1, sub) if g % d == 0]

    def tiled_step_bytes(bn, ct):
        # identity block + output block (HW wide) + input block (hW wide)
        return bn * ct * (2 * HWp + hWp) * itemsize

    def full_step_bytes(bn):
        c1p, c2p, cop = (_round_up(C1, sub), _round_up(C2, sub),
                         _round_up(C1 + C2, sub))
        return bn * (c1p * HWp + c2p * hWp + cop * HWp) * itemsize

    if valid_cts:
        ct = valid_cts[0]                         # smallest legal tile
        for cand in sorted(valid_cts, reverse=True):
            if tiled_step_bytes(1, cand) <= _TARGET_STEP_BYTES:
                ct = cand                         # largest tile under budget
                break
        n_cblocks = (C1 + C2) // ct
        max_steps = N * n_cblocks
        min_steps = min(_MIN_GRID_STEPS, max_steps)
        bn = 1
        for cand in range(N, 0, -1):
            if (tiled_step_bytes(cand, ct) <= _TARGET_STEP_BYTES
                    and _cdiv(N, cand) * n_cblocks >= min_steps):
                bn = cand
                break
        return {"mode": "tiled", "bn": bn, "ct": ct,
                "step_bytes": tiled_step_bytes(bn, ct)}

    # Fallback (no legal common channel tile, e.g. tiny/odd channel counts):
    # keep full channels per step and block only the batch.
    min_steps = min(_MIN_GRID_STEPS, N)
    bn = 1
    for cand in range(N, 0, -1):
        if full_step_bytes(cand) <= _TARGET_STEP_BYTES and _cdiv(N, cand) >= min_steps:
            bn = cand
            break
    return {"mode": "full", "bn": bn, "ct": None,
            "step_bytes": full_step_bytes(bn)}


def _vmem_limit(step_bytes):
    needed = 2 * step_bytes + (2 << 20)           # double-buffered blocks + headroom
    # Stay comfortably under v7x's 64 MiB physical VMEM; only exceed 48 MiB if
    # a single mandatory block genuinely needs it.
    return int(min(max(needed, 4 << 20), max(48 << 20, needed)))


# --------------------------------------------------------------------------
# kernels (flattened lane-dense layout: arrays are (N, C, H*W) / (N, C, h*W))
# --------------------------------------------------------------------------
def _make_tiled_kernel(n_id_blocks, top_off, int_end):
    """grid = (batch_blocks, channel_blocks); each channel block is either an
    identity slice (straight copy) or a slice of the W-pre-padded input half
    (top zeros / interior slab / bottom zeros, all full-width stores)."""

    def kernel(id_ref, in_ref, out_ref):
        c = pl.program_id(1)
        hw = out_ref.shape[-1]

        @pl.when(c < n_id_blocks)
        def _copy_identity():
            out_ref[...] = id_ref[...]

        @pl.when(c >= n_id_blocks)
        def _write_padded():
            bn, ct, _ = out_ref.shape
            if top_off > 0:
                out_ref[:, :, :top_off] = jnp.zeros((bn, ct, top_off), out_ref.dtype)
            out_ref[:, :, top_off:int_end] = in_ref[...]
            if int_end < hw:
                out_ref[:, :, int_end:] = jnp.zeros((bn, ct, hw - int_end),
                                                    out_ref.dtype)

    return kernel


def _make_full_channel_kernel(C1, C2, top_off, int_end):
    """grid = (batch_blocks,); one step writes all C1+C2 channels of a batch block."""

    def kernel(id_ref, in_ref, out_ref):
        bn = out_ref.shape[0]
        hw = out_ref.shape[-1]
        out_ref[:, :C1, :] = id_ref[...]
        if top_off > 0:
            out_ref[:, C1:, :top_off] = jnp.zeros((bn, C2, top_off), out_ref.dtype)
        out_ref[:, C1:, top_off:int_end] = in_ref[...]
        if int_end < hw:
            out_ref[:, C1:, int_end:] = jnp.zeros((bn, C2, hw - int_end),
                                                  out_ref.dtype)

    return kernel


# --------------------------------------------------------------------------
# wrapper
# --------------------------------------------------------------------------
def upcat(input_x, identity):
    """Pallas implementation of UpCat.forward.

    input_x : (N, C2, h, w)
    identity: (N, C1, H, W)
    returns : (N, C1+C2, H, W) == torch.cat([identity, F.pad(input_x, ...)], dim=1)
    """
    N, C1, H, W = identity.shape
    Ni, C2, h, w = input_x.shape
    assert N == Ni, "batch mismatch"
    assert input_x.dtype == identity.dtype, "dtype mismatch"
    diffY, diffX = H - h, W - w
    assert diffY >= 0 and diffX >= 0, "input must not be larger than identity"
    top, left = diffY // 2, diffX // 2
    right = diffX - left

    # Wrapper-side W pre-pad of the small tensor (cheap XLA pad): the kernel
    # then never emits narrow left/right border stores.
    if diffX > 0:
        input_x = jnp.pad(input_x, ((0, 0), (0, 0), (0, 0), (left, right)))

    # Lane-dense flattened layout.
    HW, hW = H * W, h * W
    id_flat = identity.reshape(N, C1, HW)
    in_flat = input_x.reshape(N, C2, hW)

    itemsize = jnp.dtype(identity.dtype).itemsize
    plan = _choose_tiling(N, C1, C2, HW, hW, itemsize)
    bn = plan["bn"]
    top_off, int_end = top * W, (top + h) * W
    vmem_limit = _vmem_limit(plan["step_bytes"])

    out_shape = jax.ShapeDtypeStruct((N, C1 + C2, HW), identity.dtype)

    if plan["mode"] == "tiled":
        ct = plan["ct"]
        n_id_blocks = C1 // ct
        n_ch_blocks = (C1 + C2) // ct
        grid = (_cdiv(N, bn), n_ch_blocks)
        kernel = _make_tiled_kernel(n_id_blocks, top_off, int_end)
        # Clamped index maps: the input not used by a given step keeps its
        # previous block index, so the pipeline skips its re-fetch.
        id_spec = pl.BlockSpec(
            (bn, ct, HW), lambda b, c: (b, jnp.minimum(c, n_id_blocks - 1), 0))
        in_spec = pl.BlockSpec(
            (bn, ct, hW), lambda b, c: (b, jnp.maximum(c - n_id_blocks, 0), 0))
        out_spec = pl.BlockSpec((bn, ct, HW), lambda b, c: (b, c, 0))
        dim_sem = ("parallel", "parallel")
    else:
        grid = (_cdiv(N, bn),)
        kernel = _make_full_channel_kernel(C1, C2, top_off, int_end)
        id_spec = pl.BlockSpec((bn, C1, HW), lambda b: (b, 0, 0))
        in_spec = pl.BlockSpec((bn, C2, hW), lambda b: (b, 0, 0))
        out_spec = pl.BlockSpec((bn, C1 + C2, HW), lambda b: (b, 0, 0))
        dim_sem = ("parallel",)

    out = pl.pallas_call(
        kernel,
        out_shape=out_shape,
        grid=grid,
        in_specs=[id_spec, in_spec],
        out_specs=out_spec,
        compiler_params=pltpu.CompilerParams(
            dimension_semantics=dim_sem,
            vmem_limit_bytes=vmem_limit,
        ),
    )(id_flat, in_flat)

    return out.reshape(N, C1 + C2, H, W)


def upcat_reference(input_x, identity):
    """Pure-JAX reference mirroring the PyTorch forward."""
    H, W = identity.shape[2], identity.shape[3]
    h, w = input_x.shape[2], input_x.shape[3]
    diffY, diffX = H - h, W - w
    padded = jnp.pad(
        input_x,
        ((0, 0), (0, 0),
         (diffY // 2, diffY - diffY // 2),
         (diffX // 2, diffX - diffX // 2)),
    )
    return jnp.concatenate([identity, padded], axis=1)


if __name__ == "__main__":
    key = jax.random.PRNGKey(0)
    k1, k2 = jax.random.split(key)

    # 1) Canonical UpCat demo shapes: symmetric pad of 2 on every side.
    N, C1, H, W = 2, 4, 16, 16
    C2, h, w = 4, 12, 12
    identity = jax.random.normal(k1, (N, C1, H, W), dtype=jnp.float32)
    input_x = jax.random.normal(k2, (N, C2, h, w), dtype=jnp.float32)
    out = jax.block_until_ready(upcat(input_x, identity))
    assert out.shape == (N, C1 + C2, H, W), out.shape
    assert jnp.array_equal(out, upcat_reference(input_x, identity)), "case 1 mismatch"

    # 2) Asymmetric / odd pad, unequal small channel counts (full-channel path).
    identity2 = jax.random.normal(k1, (N, 3, 16, 16), dtype=jnp.float32)
    input2 = jax.random.normal(k2, (N, 5, 13, 10), dtype=jnp.float32)
    out2 = jax.block_until_ready(upcat(input2, identity2))
    assert jnp.array_equal(out2, upcat_reference(input2, identity2)), "case 2 mismatch"

    # 3) No padding at all (h == H, w == W).
    input3 = jax.random.normal(k2, (N, 2, 16, 16), dtype=jnp.float32)
    out3 = jax.block_until_ready(upcat(input3, identity))
    assert jnp.array_equal(out3, upcat_reference(input3, identity)), "case 3 mismatch"

    # 4) Channel counts large enough to exercise the channel-tiled path
    #    (ct=16 -> multiple identity blocks + clamped index maps + pl.when).
    identity4 = jax.random.normal(k1, (2, 32, 32, 32), dtype=jnp.float32)
    input4 = jax.random.normal(k2, (2, 16, 27, 27), dtype=jnp.float32)
    out4 = jax.block_until_ready(upcat(input4, identity4))
    assert jnp.array_equal(out4, upcat_reference(input4, identity4)), "case 4 mismatch"

    print("KERNEL_OK")
</pallas_src>

<mosaic_0001>
module attributes {stable_mosaic.version = 11 : i64} {
  func.func @kernel(%arg0: i32, %arg1: memref<1x4x256xf32, #tpu.memory_space<vmem>>, %arg2: memref<1x4x192xf32, #tpu.memory_space<vmem>>, %arg3: memref<1x8x256xf32, #tpu.memory_space<vmem>>) attributes {dimension_semantics = [#tpu.dimension_semantics<parallel>], iteration_bounds = array<i64: 2>, scalar_prefetch = 0 : i64, scratch_operands = 0 : i64, tpu.core_type = #tpu.core_type<tc>, window_params = [{transform_indices = @transform_0, window_bounds = array<i64: 1, 4, 256>}, {transform_indices = @transform_1, window_bounds = array<i64: 1, 4, 192>}, {transform_indices = @transform_2, window_bounds = array<i64: 1, 8, 256>}]} {
    %c0 = arith.constant 0 : index
    %c0_0 = arith.constant 0 : index
    %c0_1 = arith.constant 0 : index
    %0 = vector.load %arg1[%c0, %c0_0, %c0_1] : memref<1x4x256xf32, #tpu.memory_space<vmem>>, vector<1x4x256xf32>
    %c0_2 = arith.constant 0 : index
    %c0_3 = arith.constant 0 : index
    %c0_4 = arith.constant 0 : index
    %1 = vector.load %arg3[%c0_2, %c0_3, %c0_4] : memref<1x8x256xf32, #tpu.memory_space<vmem>>, vector<1x4x256xf32>
    tpu.vector_store %arg3[%c0_2, %c0_3, %c0_4], %0 {strides = array<i32>} : memref<1x8x256xf32, #tpu.memory_space<vmem>>, vector<1x4x256xf32>,
    %cst = arith.constant 0.000000e+00 : f32
    %2 = vector.broadcast %cst : f32 to vector<1x4x32xf32>
    %c0_5 = arith.constant 0 : index
    %c4 = arith.constant 4 : index
    %c0_6 = arith.constant 0 : index
    %3 = vector.load %arg3[%c0_5, %c4, %c0_6] : memref<1x8x256xf32, #tpu.memory_space<vmem>>, vector<1x4x32xf32>
    tpu.vector_store %arg3[%c0_5, %c4, %c0_6], %2 {strides = array<i32>} : memref<1x8x256xf32, #tpu.memory_space<vmem>>, vector<1x4x32xf32>,
    %c0_7 = arith.constant 0 : index
    %c0_8 = arith.constant 0 : index
    %c0_9 = arith.constant 0 : index
    %4 = vector.load %arg2[%c0_7, %c0_8, %c0_9] : memref<1x4x192xf32, #tpu.memory_space<vmem>>, vector<1x4x192xf32>
    %c0_10 = arith.constant 0 : index
    %c4_11 = arith.constant 4 : index
    %c32 = arith.constant 32 : index
    %5 = vector.load %arg3[%c0_10, %c4_11, %c32] : memref<1x8x256xf32, #tpu.memory_space<vmem>>, vector<1x4x192xf32>
    tpu.vector_store %arg3[%c0_10, %c4_11, %c32], %4 {strides = array<i32>} : memref<1x8x256xf32, #tpu.memory_space<vmem>>, vector<1x4x192xf32>,
    %cst_12 = arith.constant 0.000000e+00 : f32
    %6 = vector.broadcast %cst_12 : f32 to vector<1x4x32xf32>
    %c0_13 = arith.constant 0 : index
    %c4_14 = arith.constant 4 : index
    %c224 = arith.constant 224 : index
    %7 = vector.load %arg3[%c0_13, %c4_14, %c224] : memref<1x8x256xf32, #tpu.memory_space<vmem>>, vector<1x4x32xf32>
    tpu.vector_store %arg3[%c0_13, %c4_14, %c224], %6 {strides = array<i32>} : memref<1x8x256xf32, #tpu.memory_space<vmem>>, vector<1x4x32xf32>,
    return
  }
  func.func @transform_0(%arg0: i32) -> (i32, i32, i32) {
    %c0_i32 = arith.constant 0 : i32
    %c0_i32_0 = arith.constant 0 : i32
    %c0_i32_1 = arith.constant 0 : i32
    return %arg0, %c0_i32, %c0_i32_0 : i32, i32, i32
  }
  func.func @transform_1(%arg0: i32) -> (i32, i32, i32) {
    %c0_i32 = arith.constant 0 : i32
    %c0_i32_0 = arith.constant 0 : i32
    %c0_i32_1 = arith.constant 0 : i32
    return %arg0, %c0_i32, %c0_i32_0 : i32, i32, i32
  }
  func.func @transform_2(%arg0: i32) -> (i32, i32, i32) {
    %c0_i32 = arith.constant 0 : i32
    %c0_i32_0 = arith.constant 0 : i32
    %c0_i32_1 = arith.constant 0 : i32
    return %arg0, %c0_i32, %c0_i32_0 : i32, i32, i32
  }
}

</mosaic_0001>

<bundles_post_ra>
// kernel: tpu_custom_call.1
= control target key start
LH: loop header
LB: loop body
LE: loop exit
PB: predicated region body
PF: predicated region fallthrough
CT: control target
= control target key end

     0   :  { %7 = vsyncpa [#allocation3], 0  ;;  %s769_s0 = inlined_call_operand.hbm [shape: f32[2,4,256], index: 0, kind: input, shape index: {}]   ;;  %s770_s1 = inlined_call_operand.hbm [shape: f32[2,4,192], index: 1, kind: input, shape index: {}]   ;;  %s771_s2 = inlined_call_operand.hbm [shape: f32[2,8,256], index: 2, kind: output, shape index: {}]  }
   0x1   :  { %9 = vsyncpa [#allocation3 + $0x1], 0 }
   0x2   :  { %10 = vsyncpa [#allocation6], 0 }
   0x3   :  { %12 = vsyncpa [#allocation6 + $0x1], 0 }
   0x4   :  { %13 = vsyncpa [#allocation4], 0 }
   0x5   :  { %15 = vsyncpa [#allocation4 + $0x1], 0  ;;  %s559_s9 = smov 0   ;;  %s561_s10 = smov 0  }
   0x6   :  { %s563_s11 = smov 0   ;;  %s565_s12 = smov 0  }
   0x7 LB: > { %s580_s13 = sadd.s32 4294967295, %s537_s12   ;;  %s331_s14 = sadd.s32 4294967294, %s537_s12   ;;  %s537_s12 = sphi %s565_s12, %s790_s12   ;;  %s533_s11 = sphi %s563_s11, %s789_s11   ;;  %s529_s10 = sphi %s561_s10, %s788_s10   ;;  %s525_s9 = sphi %s559_s9, %s787_s9  }
   0x8   : > { %s584_s15 = sadd.s32 1, %s537_s12   ;;  %s28_s16 = sadd.s32 1, %s533_s11 }
   0x9   : > { %s25_s17 = ssub.s32 %s537_s12, %s584_s15  ;;  %p35_p0 = scmp.ne.s32.totalorder %s533_s11, %s529_s10 }
   0xa   : > { %p26_p1 = scmp.eq.s32.totalorder %s25_s17, 0  ;;  %p36_p2 = scmp.eq.s32.totalorder %s537_s12, 0 }
   0xb   : > { %p41_p3 = scmp.ne.s32.totalorder %s529_s10, %s525_s9  ;;  %p42_p4 = scmp.eq.s32.totalorder %s580_s13, 0 }
   0xc   : > { %s596_s18 = scalar_select %p26_p1, %s533_s11, %s28_s16  }
   0xd   : > { %p598_p5 = por %p36_p2, %p35_p0  ;;  %p602_p6 = por %p42_p4, %p41_p3 }
   0xe   : > { %p91_p7 = scmp.eq.s32.totalorder %s580_s13, 1  ;;  %p97_p8 = scmp.eq.s32.totalorder %s331_s14, 1 }
   0xf   : > { %s775_s20 = scalar_select %p602_p6, 1, 0 }
  0x10   : > { %p369_p10 = scmp.lt.s32.totalorder %s537_s12, 2  ;;  %p609_p11 = por %p91_p7, %p35_p0 }
  0x11   : > { %p613_p12 = por %p97_p8, %p41_p3  ;;  %s618_s23 = sand.u32 1, %s533_s11  }
  0x12   : > { %s776_s21 = scalar_select %p609_p11, 1, 0 }
  0x13   : > { %s777_s22 = scalar_select %p613_p12, 1, 0 }
  0x14   : > { %s349_s24 = sshll.u32 %s537_s12, 7  ;;  %s334_s25 = sshll.u32 %s618_s23, 3 }
  0x15   : > { %s627_s28 = scalar_lea.hbm %s769_s0, %s349_s24  ;;  %s121_s29 = scalar_lea.vmem [#allocation2], %s334_s25 }
  0x16   : > { %s129_s30 = sshll.u32 %s121_s29, 4  ;;  %p633_p13 = pnand %p369_p10, %p598_p5  ;;  %s637_s30 = int_to_ptr.vmem [resolvable:$true] %s129_s30 }
  0x17   : > { %s118_s4 = scalar_lea.sflag [#allocation3], %s618_s23  ;;  %s407_s5 = scalar_lea.hbm %s627_s28, 128 }
  0x18   : > { %p408_p2 = scmp.ne.s32.totalorder %s627_s28, %s407_s5  ;;  %p409_p3 = pneg %p633_p13 }
  0x19   : > { %s412_s8 = scalar_lea.hbm %s769_s0, 256  ;;  %p413_p5 = scmp.lt.u32.totalorder %s627_s28, %s769_s0 }
  0x1a   : > { %p410_p4 = pnand %p409_p3, %p408_p2  ;;  %p414_p8 = scmp.lt.u32.totalorder %s412_s8, %s407_s5 }
  0x1b   : > { %p416_p9 = scmp.lt.u32.totalorder %s407_s5, %s627_s28 }
  0x1c   : > { %p411_p7 = pneg %p410_p4  ;;  %p415_p10 = por %p414_p8, %p413_p5 }
  0x1e   : > { %p417_p0 = por %p416_p9, %p415_p10 }
  0x20   : > { %p418_p1 = pnand %p417_p0, %p411_p7 }
  0x22   : > { %421 = shalt.err (!%p418_p1)
}
  0x23   : > { %s422_s17 = scalar_lea.vmem %s637_s30, 128  ;;  %s539_s19 = smov [#allocation2]  }
  0x24   : > { %p423_p2 = scmp.ne.s32.totalorder %s637_s30, %s422_s17  ;;  %s427_s26 = sshll.u32 %s539_s19, 4  ;;  %s428_s26 = int_to_ptr.vmem [resolvable:$false] %s427_s26 }
  0x25   : > { %s429_s27 = scalar_lea.vmem %s428_s26, 256  ;;  %p430_p11 = scmp.lt.s32.totalorder %s637_s30, %s428_s26 }
  0x26   : > { %p425_p4 = pnand %p423_p2, %p409_p3  ;;  %p431_p5 = scmp.lt.s32.totalorder %s429_s27, %s422_s17 }
  0x28   : > { %p426_p12 = pneg %p425_p4  ;;  %p432_p8 = por %p431_p5, %p430_p11 }
  0x2a   : > { %p433_p9 = pnand %p432_p8, %p426_p12 }
  0x2c   : > { %436 = shalt.err (!%p433_p9)
}
  0x2d   : > { %361 = dma.hbm_to_vmem [thread:$0]  (!%p633_p13), %s627_s28, 128, %s637_s30, %s118_s4  }
  0x2e   : > { %p779_p0 = scmp.lt.s32.totalorder %s537_s12, 3  ;;  %p780_p1 = scmp.ge.s32.totalorder %s537_s12, 1 }
  0x2f   : > { %s680_s7 = scalar_lea.hbm %s770_s1, %s349_s24  ;;  %s140_s8 = scalar_lea.vmem [#allocation5], %s334_s25 }
  0x30   : > { %p671_p7 = pnand %p780_p1, %p779_p0  ;;  %s148_s14 = sshll.u32 %s140_s8, 4  ;;  %s149_s14 = int_to_ptr.vmem [resolvable:$true] %s148_s14 }
  0x31   : > { %s137_s28 = scalar_lea.sflag [#allocation6], %s618_s23  ;;  %s437_s30 = scalar_lea.hbm %s680_s7, 128 }
  0x32   : > { %s781_s29 = scalar_select %p671_p7, 1, 0 }
  0x33   : > { %p438_p11 = scmp.ne.s32.totalorder %s680_s7, %s437_s30  ;;  %s442_s24 = scalar_lea.hbm %s770_s1, 256 }
  0x34   : > { %p443_p2 = scmp.lt.u32.totalorder %s680_s7, %s770_s1  ;;  %p444_p4 = scmp.lt.u32.totalorder %s442_s24, %s437_s30 }
  0x35   : > { %p440_p12 = pnand %p438_p11, %p409_p3  ;;  %p446_p8 = scmp.lt.u32.totalorder %s437_s30, %s680_s7 }
  0x36   : > { %p445_p5 = por %p444_p4, %p443_p2 }
  0x37   : > { %p441_p10 = pneg %p440_p12 }
  0x38   : > { %p447_p9 = por %p446_p8, %p445_p5 }
  0x3a   : > { %p448_p0 = pnand %p447_p9, %p441_p10 }
  0x3c   : > { %451 = shalt.err (!%p448_p0)
}
  0x3d   : > { %s452_s23 = scalar_lea.vmem %s149_s14, 128  ;;  %s540_s25 = smov [#allocation5]  }
  0x3e   : > { %p453_p1 = scmp.ne.s32.totalorder %s149_s14, %s452_s23  ;;  %s457_s26 = sshll.u32 %s540_s25, 4  ;;  %s458_s26 = int_to_ptr.vmem [resolvable:$false] %s457_s26 }
  0x3f   : > { %s459_s27 = scalar_lea.vmem %s458_s26, 256  ;;  %p460_p6 = scmp.lt.s32.totalorder %s149_s14, %s458_s26 }
  0x40   : > { %p455_p11 = pnand %p453_p1, %p409_p3  ;;  %p461_p7 = scmp.lt.s32.totalorder %s459_s27, %s452_s23 }
  0x42   : > { %p456_p12 = pneg %p455_p11  ;;  %p462_p2 = por %p461_p7, %p460_p6 }
  0x44   : > { %p463_p4 = pnand %p462_p2, %p456_p12 }
  0x46   : > { %466 = shalt.err (!%p463_p4)
}
  0x47   : > { %364 = dma.hbm_to_vmem [thread:$0]  (!%p633_p13), %s680_s7, 128, %s149_s14, %s137_s28  }
  0x48   : > { %p782_p10 = scmp.ne.s32.totalorder %s781_s29, 0 }
  0x49   : > { %s707_s5 = sand.u32 (!%p782_p10), 1, %s529_s10   ;;  %p783_p3 = scmp.ne.s32.totalorder (!%p782_p10), %s775_s20, 0 }
  0x4a   : > { %157 = sbr.rel (%p782_p10) target bundleno = 222 (0xde), region = 28  ;;  %s341_s6 = sshll.u32 (!%p782_p10), %s707_s5, 3 }
  0x4b   : > { %s160_s8 = scalar_lea.sflag (!%p782_p10), [#allocation3], %s707_s5  ;;  %s163_s30 = scalar_lea.vmem (!%p782_p10), [#allocation2], %s341_s6 }
  0x51   : > { %512 = dma.done.wait (%p783_p3), %s160_s8, 128  }
  0x52   : > { %514 = vsyncadd (%p783_p3), %s160_s8, 4294967168  ;;  %s169_s3 = scalar_lea.sflag [#allocation6], %s707_s5  ;;  %s172_s7 = scalar_lea.vmem [#allocation5], %s341_s6 }
  0x53   : > { %516 = dma.done.wait (%p783_p3), %s169_s3, 128  }
  0x54   : > { %518 = vsyncadd (%p783_p3), %s169_s3, 4294967168  ;;  %s343_s29 = sshll.u32 %s707_s5, 4  ;;  %vm204_vm0 = vcmask 261124   ;;  %v541_v0 = vmov 0.0   ;;  %v206_v1 = vld [vmem:[%s172_s7] sm:$0xff]  ;;  %v198_v2 = vld [vmem:[%s163_s30] sm:$0xff] }
  0x55   : > { %s197_s14 = scalar_lea.vmem [#allocation7], %s343_s29  ;;  %v208_v3 = vcombine.low %v206_v1, %v206_v1  ;;  %v200_v4 = vcombine.high %v198_v2, %v198_v2  ;;  %s542_s28 = smov 32   ;;  %vm217_vm1 = vcmask 1047812   ;;  %vm213_vm2 = vcmask 261120  }
  0x56   : > { %205 = vst.msk [vmem:[%s197_s14] sm:$0xf0] %vm204_vm0, %v541_v0  ;;  %202 = vst [vmem:[%s197_s14] sm:$0xf] %v198_v2  ;;  %s351_s20 = sshll.u32 %s580_s13, 8  ;;  %s238_s4 = sshll.u32 %s197_s14, 4  ;;  %vm219_vm3 = vcmask 785412   ;;  %s727_s4 = int_to_ptr.vmem [resolvable:$true] %s238_s4 }
  0x57   : > { %209 = vrot.lane.b32.xlu0 %v208_v3, %s542_s28  ;;  %203 = vst [vmem:[%s197_s14 + $0x8] sm:$0xf] %v200_v4  ;;  %vm221_vm4 = vcmask 1048324   ;;  %s725_s17 = scalar_lea.hbm %s771_s2, %s351_s20  ;;  %s224_s19 = scalar_lea.sflag [#allocation4], %s707_s5 }
  0x58   : > { %s467_s23 = scalar_lea.vmem %s727_s4, 256  ;;  %p784_p13 = scmp.ne.s32.totalorder %s776_s21, 0 }
  0x59   : > { %p468_p6 = scmp.ne.s32.totalorder %s727_s4, %s467_s23  ;;  %s543_s13 = smov [#allocation7]  }
  0x5a   : > { %s471_s25 = sshll.u32 %s543_s13, 4  ;;  %s472_s25 = int_to_ptr.vmem [resolvable:$false] %s471_s25 }
  0x5b   : > { %211 = vrot.lane.b32.xlu0 %v206_v1, %s542_s28  ;;  %p469_p7 = pnand %p468_p6, %p784_p13  ;;  %s473_s26 = scalar_lea.vmem %s472_s25, 512 }
  0x5c   : > { %p474_p8 = scmp.lt.s32.totalorder %s727_s4, %s472_s25  ;;  %p475_p9 = scmp.lt.s32.totalorder %s473_s26, %s467_s23 }
  0x5d   : > { %p470_p5 = pneg %p469_p7 }
  0x5e   : > { %p476_p0 = por %p475_p9, %p474_p8 }
  0x60   : > { %p477_p1 = pnand %p476_p0, %p470_p5 }
  0xc9   : > { %v210_v5 = vpop.permute.xlu0 %209 }
  0xca   : > { %218 = vst.msk [vmem:[%s197_s14] sm:$0xf0] %vm217_vm1, %v210_v5 }
  0xcd   : > { %v212_v6 = vpop.permute.xlu0 %211 }
  0xce   : > { %v214_v7 = vsel %vm213_vm2, %v210_v5, %v212_v6 }
  0xcf   : > { %220 = vst.msk [vmem:[%s197_s14 + $0x8] sm:$0xf0] %vm219_vm3, %v214_v7 }
  0xd0   : > { %222 = vst.msk [vmem:[%s197_s14 + $0x8] sm:$0xf0] %vm221_vm4, %v541_v0 }
  0xd1   : > { %480 = shalt.err (!%p477_p1)
}
  0xd2   : > { %s481_s27 = scalar_lea.hbm %s725_s17, 256  ;;  %s485_s8 = scalar_lea.hbm %s771_s2, 512 }
  0xd3   : > { %p482_p11 = scmp.ne.s32.totalorder %s725_s17, %s481_s27  ;;  %p486_p4 = scmp.lt.u32.totalorder %s725_s17, %s771_s2 }
  0xd4   : > { %p487_p10 = scmp.lt.u32.totalorder %s485_s8, %s481_s27  ;;  %p489_p6 = scmp.lt.u32.totalorder %s481_s27, %s725_s17 }
  0xd5   : > { %p483_p12 = pnand %p482_p11, %p784_p13 }
  0xd6   : > { %p488_p3 = por %p487_p10, %p486_p4 }
  0xd7   : > { %p484_p2 = pneg %p483_p12 }
  0xd8   : > { %p490_p7 = por %p489_p6, %p488_p3 }
  0xda   : > { %p491_p5 = pnand %p490_p7, %p484_p2 }
  0xdc   : > { %494 = shalt.err (!%p491_p5)
}
  0xdd   : > { %356 = dma.vmem_to_hbm [thread:$0]  (%p784_p13), %s727_s4, 256, %s725_s17, %s224_s19  }
  0xde PF: > { %s250_s7 = sand.u32 1, %s525_s9   ;;  %p785_p8 = scmp.ne.s32.totalorder %s777_s22, 0 }
  0xdf   : > { %p786_p9 = scmp.ge.s32.totalorder %s537_s12, 2  ;;  %s251_s29 = scalar_lea.sflag [#allocation4], %s250_s7 }
  0xe1   : > { %p366_p0 = pnand %p786_p9, %p785_p8 }
  0xe3   : > { %520 = dma.done.wait (!%p366_p0), %s251_s29, 256  }
  0xe4   : > { %522 = vsyncadd (!%p366_p0), %s251_s29, 4294967040  ;;  %p18_p1 = scmp.ge.s32.totalorder %s584_s15, 4   ;;  %s787_s9 = smov %s529_s10 }
  0xe5   : > { %s788_s10 = smov %s533_s11  ;;  %s789_s11 = smov %s596_s18 }
  0xe6   : > { %s790_s12 = smov %s584_s15  ;;  %20 = sbr.rel (!%p18_p1) target bundleno = 7 (0x7), region = 86 }
  0xed   :  { %256 = vsyncpa [#allocation3], 1 }
  0xee   :  { %258 = vsyncpa [#allocation3 + $0x1], 1 }
  0xef   :  { %259 = vsyncpa [#allocation6], 1 }
  0xf0   :  { %261 = vsyncpa [#allocation6 + $0x1], 1 }
  0xf1   :  { %262 = vsyncpa [#allocation4], 1 }
  0xf2   :  { %264 = vsyncpa [#allocation4 + $0x1], 1 }

</bundles_post_ra>
